<compile_context>
chip_gen: v7x
topology: tpu7x:2x2x1
jax: 0.10.0
libtpu: 0.0.40
codegen_flags: <defaults>
</compile_context>

<pallas_src>
import jax
import jax.numpy as jnp
from jax.experimental import pallas as pl
from jax.experimental.pallas import tpu as pltpu


def _make_kernel(BT, TB, TK, Fin, Fout):
    nch = TB // TK              # number of lane-aligned Theta chunks
    cin = TK * Fin              # chunk width on the input-feature side
    cout = TK * Fout            # chunk width on the output-feature side

    def kernel(adj_ref, w_ref, x_ref, o_ref):
        # adj_ref : (N, N)              w_ref : (TK*Fin, TK*Fout)  (resident)
        # x_ref   : (BT, N, TB*Fin)     o_ref : (BT, N, TB*Fout)
        adj = adj_ref[...]
        w = w_ref[...]
        for b in range(BT):                               # unrolled, BT small
            # graph aggregation over vertices (all TB timesteps fused on lanes)
            h = jnp.dot(adj, x_ref[b],
                        preferred_element_type=jnp.float32)  # (N, TB*Fin) f32
            h = h.astype(w.dtype)     # native-dtype MXU feed (no-op for f32)
            for c in range(nch):                           # unrolled, static
                y = jnp.dot(h[:, c * cin:(c + 1) * cin], w,
                            preferred_element_type=jnp.float32)  # (N, cout)
                o_ref[b, :, c * cout:(c + 1) * cout] = (
                    jnp.maximum(y, 0.0).astype(o_ref.dtype))
    return kernel


def _choose_tiles(B, N, T, Fin, Fout, dsize,
                  target_step_bytes=2 << 20,
                  max_step_bytes=6 << 20,
                  max_wtile_bytes=2 << 20):
    """Pick (BT, TB, TK): batch tile, time tile, Theta kron factor."""

    def step_bytes(tb, bt=1):
        return bt * N * tb * (Fin + Fout) * dsize

    # --- time tile TB: divisor of T with lane-dense fused minor dims
    #     (TB*Fin and TB*Fout multiples of 128) or the full extent T. ---
    cands = []
    for tb in range(1, T + 1):
        if T % tb:
            continue
        lane_ok = (tb * Fin) % 128 == 0 and (tb * Fout) % 128 == 0
        if lane_ok or tb == T:
            cands.append(tb)
    # Maximize TB subject to the per-step byte cap and >= 2 grid steps
    # (so both v7x TensorCores are used) whenever the problem has >= 2 slices.
    tb_sel = cands[0]
    for tb in cands:
        if step_bytes(tb) > max_step_bytes:
            continue
        if B * (T // tb) < 2 and B * T >= 2:
            continue
        tb_sel = max(tb_sel, tb)
    TB = tb_sel
    # TODO(synk): for huge N*T*Fin with no lane-dense divisor of T, pad T
    #             instead of falling back to the full-T block.

    # --- batch tile BT: fold batch elements in until the step hits target,
    #     without dropping below 2 grid steps or blowing the byte cap. ---
    BT = 1
    for bt in range(1, B + 1):
        if B % bt:
            continue
        if step_bytes(TB, bt) > max_step_bytes:
            break
        if (B // bt) * (T // TB) < 2 and B * T >= 2:
            break
        BT = bt
        if step_bytes(TB, bt) >= target_step_bytes:
            break

    # --- Theta kron factor TK: smallest divisor of TB with 128-aligned chunk
    #     widths and a small weight tile (minimal MXU redundancy). ---
    TK = None
    for tk in range(1, TB + 1):
        if TB % tk:
            continue
        if (tk * Fin) % 128 or (tk * Fout) % 128:
            continue
        if tk * tk * Fin * Fout * dsize > max_wtile_bytes:
            continue
        TK = tk
        break
    if TK is None:
        if TB * TB * Fin * Fout * dsize <= max_wtile_bytes:
            TK = TB   # single full-width chunk: no slicing at all
        else:
            TK = 1    # correct but narrow (possibly masked) stores
            # TODO(synk): pad Fin/Fout to 128 for pathological feature sizes.
    return BT, TB, TK


def spatial_gcn(x, adj, w):
    """x: (B, N, T, F_in), adj: (N, N), w: (F_out, F_in) -> (B, N, T, F_out)."""
    B, N, T, Fin = x.shape
    Fout = w.shape[0]
    dsize = jnp.dtype(x.dtype).itemsize
    BT, TB, TK = _choose_tiles(B, N, T, Fin, Fout, dsize)

    # Free row-major reshape only -- no HBM transpose round trips.
    x_fused = x.reshape(B, N, T * Fin)                       # (B, N, T*F_in)
    # Small block-diagonal Theta tile: kron(I_TK, W^T), (TK*F_in, TK*F_out),
    # built in the input dtype so the MXU runs at native rate.
    w_tile = jnp.kron(jnp.eye(TK, dtype=x.dtype), w.T.astype(x.dtype))
    adj_c = adj.astype(x.dtype)

    grid = (B // BT, T // TB)
    out = pl.pallas_call(
        _make_kernel(BT, TB, TK, Fin, Fout),
        out_shape=jax.ShapeDtypeStruct((B, N, T * Fout), x.dtype),
        grid_spec=pltpu.PrefetchScalarGridSpec(
            num_scalar_prefetch=0,
            grid=grid,
            in_specs=[
                pl.BlockSpec((N, N), lambda b, t: (0, 0)),                 # adj (resident)
                pl.BlockSpec((TK * Fin, TK * Fout), lambda b, t: (0, 0)),  # Theta tile (resident)
                pl.BlockSpec((BT, N, TB * Fin), lambda b, t: (b, 0, t)),   # x block
            ],
            out_specs=pl.BlockSpec((BT, N, TB * Fout), lambda b, t: (b, 0, t)),
        ),
        compiler_params=pltpu.CompilerParams(
            dimension_semantics=("parallel", "parallel"),
            vmem_limit_bytes=32 * 1024 * 1024),   # blocks capped so this fits v5e/v6e/v7x
    )(adj_c, w_tile, x_fused)

    return out.reshape(B, N, T, Fout)


def _reference(x, adj, w):
    """Pure-JAX mirror of the PyTorch forward."""
    B, N, T, Fin = x.shape
    Fout = w.shape[0]
    xr = jnp.transpose(x, (0, 2, 1, 3)).reshape(-1, N, Fin)   # (B*T, N, F_in)
    h = jnp.matmul(adj, xr)                                   # A @ x
    y = jnp.einsum("bnf,of->bno", h, w)                       # Theta (no bias)
    y = jax.nn.relu(y).reshape(B, T, N, Fout).transpose(0, 2, 1, 3)
    return y                                                  # (B, N, T, F_out)


if __name__ == "__main__":
    key = jax.random.PRNGKey(0)
    B, N, T, Fin, Fout = 2, 16, 8, 32, 32     # (batch, vertices, timesteps, features)
    kx, ka, kw = jax.random.split(key, 3)

    x = jax.random.normal(kx, (B, N, T, Fin), dtype=jnp.float32)

    # Deterministic symmetric-normalized adjacency: D^-1/2 (A + I) D^-1/2
    a = jax.random.uniform(ka, (N, N))
    a = ((a + a.T) * 0.5 > 0.6).astype(jnp.float32)
    a = a + jnp.eye(N, dtype=jnp.float32)
    d_inv_sqrt = 1.0 / jnp.sqrt(jnp.sum(a, axis=1))
    adj = a * d_inv_sqrt[:, None] * d_inv_sqrt[None, :]

    w = jax.random.normal(kw, (Fout, Fin), dtype=jnp.float32) / jnp.sqrt(Fin)

    out = spatial_gcn(x, adj, w)
    out = jax.block_until_ready(out)

    ref = _reference(x, adj, w)
    assert out.shape == (B, N, T, Fout)
    assert jnp.allclose(out, ref, atol=1e-4, rtol=1e-4), \
        float(jnp.max(jnp.abs(out - ref)))

    print("KERNEL_OK")
</pallas_src>

<mosaic_0001>
module attributes {stable_mosaic.version = 11 : i64} {
  func.func @kernel(%arg0: i32, %arg1: i32, %arg2: memref<16x16xf32, #tpu.memory_space<vmem>>, %arg3: memref<128x128xf32, #tpu.memory_space<vmem>>, %arg4: memref<1x16x256xf32, #tpu.memory_space<vmem>>, %arg5: memref<1x16x256xf32, #tpu.memory_space<vmem>>) attributes {dimension_semantics = [#tpu.dimension_semantics<parallel>, #tpu.dimension_semantics<parallel>], iteration_bounds = array<i64: 2, 1>, scalar_prefetch = 0 : i64, scratch_operands = 0 : i64, tpu.core_type = #tpu.core_type<tc>, window_params = [{pipeline_mode = #tpu.pipeline_mode<synchronous>, transform_indices = @transform_0, window_bounds = array<i64: 16, 16>}, {pipeline_mode = #tpu.pipeline_mode<synchronous>, transform_indices = @transform_1, window_bounds = array<i64: 128, 128>}, {transform_indices = @transform_2, window_bounds = array<i64: 1, 16, 256>}, {transform_indices = @transform_3, window_bounds = array<i64: 1, 16, 256>}]} {
    %c0 = arith.constant 0 : index
    %c0_0 = arith.constant 0 : index
    %0 = vector.load %arg2[%c0, %c0_0] : memref<16x16xf32, #tpu.memory_space<vmem>>, vector<16x16xf32>
    %c0_1 = arith.constant 0 : index
    %c0_2 = arith.constant 0 : index
    %1 = vector.load %arg3[%c0_1, %c0_2] : memref<128x128xf32, #tpu.memory_space<vmem>>, vector<128x128xf32>
    %c0_3 = arith.constant 0 : index
    %c0_4 = arith.constant 0 : index
    %c0_5 = arith.constant 0 : index
    %2 = vector.load %arg4[%c0_3, %c0_4, %c0_5] : memref<1x16x256xf32, #tpu.memory_space<vmem>>, vector<1x16x256xf32>
    %3 = vector.shape_cast %2 : vector<1x16x256xf32> to vector<16x256xf32>
    %cst = arith.constant dense<0.000000e+00> : vector<16x256xf32>
    %4 = tpu.matmul %0, %3, %cst {dimension_numbers = #tpu.dot_dimension_numbers<[1], [0], [0], [1], [0, 0, 1, 1], [], []>} : vector<16x16xf32>, vector<16x256xf32>, vector<16x256xf32> -> vector<16x256xf32>
    %5 = vector.extract_strided_slice %4 {offsets = [0, 0], sizes = [16, 128], strides = [1, 1]} : vector<16x256xf32> to vector<16x128xf32>
    %cst_6 = arith.constant dense<0.000000e+00> : vector<16x128xf32>
    %6 = tpu.matmul %5, %1, %cst_6 {dimension_numbers = #tpu.dot_dimension_numbers<[1], [0], [0], [1], [0, 0, 1, 1], [], []>} : vector<16x128xf32>, vector<128x128xf32>, vector<16x128xf32> -> vector<16x128xf32>
    %cst_7 = arith.constant 0.000000e+00 : f32
    %7 = vector.broadcast %cst_7 : f32 to vector<16x128xf32>
    %8 = arith.maximumf %6, %7 : vector<16x128xf32>
    %c0_8 = arith.constant 0 : index
    %c0_9 = arith.constant 0 : index
    %c0_10 = arith.constant 0 : index
    %9 = vector.load %arg5[%c0_8, %c0_9, %c0_10] : memref<1x16x256xf32, #tpu.memory_space<vmem>>, vector<1x16x128xf32>
    %10 = vector.shape_cast %9 : vector<1x16x128xf32> to vector<16x128xf32>
    %11 = vector.shape_cast %8 : vector<16x128xf32> to vector<1x16x128xf32>
    tpu.vector_store %arg5[%c0_8, %c0_9, %c0_10], %11 {strides = array<i32>} : memref<1x16x256xf32, #tpu.memory_space<vmem>>, vector<1x16x128xf32>,
    %12 = vector.extract_strided_slice %4 {offsets = [0, 128], sizes = [16, 128], strides = [1, 1]} : vector<16x256xf32> to vector<16x128xf32>
    %cst_11 = arith.constant dense<0.000000e+00> : vector<16x128xf32>
    %13 = tpu.matmul %12, %1, %cst_11 {dimension_numbers = #tpu.dot_dimension_numbers<[1], [0], [0], [1], [0, 0, 1, 1], [], []>} : vector<16x128xf32>, vector<128x128xf32>, vector<16x128xf32> -> vector<16x128xf32>
    %cst_12 = arith.constant 0.000000e+00 : f32
    %14 = vector.broadcast %cst_12 : f32 to vector<16x128xf32>
    %15 = arith.maximumf %13, %14 : vector<16x128xf32>
    %c0_13 = arith.constant 0 : index
    %c0_14 = arith.constant 0 : index
    %c128 = arith.constant 128 : index
    %16 = vector.load %arg5[%c0_13, %c0_14, %c128] : memref<1x16x256xf32, #tpu.memory_space<vmem>>, vector<1x16x128xf32>
    %17 = vector.shape_cast %16 : vector<1x16x128xf32> to vector<16x128xf32>
    %18 = vector.shape_cast %15 : vector<16x128xf32> to vector<1x16x128xf32>
    tpu.vector_store %arg5[%c0_13, %c0_14, %c128], %18 {strides = array<i32>} : memref<1x16x256xf32, #tpu.memory_space<vmem>>, vector<1x16x128xf32>,
    return
  }
  func.func @transform_0(%arg0: i32, %arg1: i32) -> (i32, i32) {
    %c0_i32 = arith.constant 0 : i32
    %c0_i32_0 = arith.constant 0 : i32
    %c0_i32_1 = arith.constant 0 : i32
    return %c0_i32, %c0_i32_0 : i32, i32
  }
  func.func @transform_1(%arg0: i32, %arg1: i32) -> (i32, i32) {
    %c0_i32 = arith.constant 0 : i32
    %c0_i32_0 = arith.constant 0 : i32
    %c0_i32_1 = arith.constant 0 : i32
    return %c0_i32, %c0_i32_0 : i32, i32
  }
  func.func @transform_2(%arg0: i32, %arg1: i32) -> (i32, i32, i32) {
    %c0_i32 = arith.constant 0 : i32
    %c0_i32_0 = arith.constant 0 : i32
    return %arg0, %c0_i32, %arg1 : i32, i32, i32
  }
  func.func @transform_3(%arg0: i32, %arg1: i32) -> (i32, i32, i32) {
    %c0_i32 = arith.constant 0 : i32
    %c0_i32_0 = arith.constant 0 : i32
    return %arg0, %c0_i32, %arg1 : i32, i32, i32
  }
}

</mosaic_0001>

<bundles_post_ra>
// kernel: tpu_custom_call.1
= control target key start
LH: loop header
LB: loop body
LE: loop exit
PB: predicated region body
PF: predicated region fallthrough
CT: control target
= control target key end

     0   :  { %8 = vsyncpa [#allocation3], 0  ;;  %s1383_s0 = inlined_call_operand.hbm [shape: f32[16,16], index: 0, kind: input, shape index: {}]   ;;  %s1384_s1 = inlined_call_operand.hbm [shape: f32[128,128], index: 1, kind: input, shape index: {}]   ;;  %s1385_s2 = inlined_call_operand.hbm [shape: f32[2,16,256], index: 2, kind: input, shape index: {}]   ;;  %s1386_s3 = inlined_call_operand.hbm [shape: f32[2,16,256], index: 3, kind: output, shape index: {}]  }
   0x1   :  { %9 = vsyncpa [#allocation6], 0 }
   0x2   :  { %10 = vsyncpa [#allocation4], 0 }
   0x3   :  { %12 = vsyncpa [#allocation4 + $0x1], 0  ;;  %s1118_s12 = smov 0   ;;  %s1120_s13 = smov 0  }
   0x4   :  { %s1122_s14 = smov 0   ;;  %s1124_s15 = smov 0  }
   0x5   :  { %s1126_s16 = smov 0   ;;  %s1128_s17 = smov 0  }
   0x6 LB: > { %s1149_s18 = sadd.s32 4294967295, %s1085_s17   ;;  %s623_s19 = sadd.s32 4294967294, %s1085_s17   ;;  %s1085_s17 = sphi %s1128_s17, %s18_s17   ;;  %s1081_s16 = sphi %s1126_s16, %s1409_s16   ;;  %s1077_s15 = sphi %s1124_s15, %s1408_s15   ;;  %s1073_s14 = sphi %s1122_s14, %s1407_s14   ;;  %s1069_s13 = sphi %s1120_s13, %s1406_s13   ;;  %s1065_s12 = sphi %s1118_s12, %s1405_s12  }
   0x7   : > { %p88_p0 = scmp.ne.s32.totalorder %s1073_s14, %s1069_s13  ;;  %p89_p1 = scmp.eq.s32.totalorder %s1085_s17, 0 }
   0x8   : > { %p94_p2 = scmp.ne.s32.totalorder %s1069_s13, %s1065_s12  ;;  %p1387_p3 = scmp.eq.s32.totalorder %s1149_s18, 0 }
   0x9   : > { %p1158_p4 = por %p89_p1, %p88_p0  ;;  %p120_p5 = scmp.eq.s32.totalorder %s1149_s18, 1 }
   0xa   : > { %p1165_p6 = por %p1387_p3, %p94_p2  ;;  %p126_p7 = scmp.eq.s32.totalorder %s623_s19, 1 }
   0xb   : > { %p1169_p8 = por %p120_p5, %p88_p0  ;;  %p624_p9 = scmp.ge.s32.totalorder %s1085_s17, 1 }
   0xc   : > { %s1391_s21 = scalar_select %p1165_p6, 1, 0 }
   0xd   : > { %s1392_s22 = scalar_select %p1169_p8, 1, 0 }
   0xe   : > { %p1174_p10 = por %p126_p7, %p94_p2  ;;  %p133_p11 = scmp.lt.s32.totalorder %s1085_s17, 3 }
   0xf   : > { %s1087_s25 = smov [#allocation2]   ;;  %p848_p1 = scmp.lt.s32.totalorder %s1085_s17, 2 }
  0x10   : > { %s1393_s23 = scalar_select %p1174_p10, 1, 0 }
  0x11   : > { %p1179_p12 = pnand %p624_p9, %p133_p11  ;;  %s145_s26 = sshll.u32 %s1087_s25, 4  ;;  %s1183_s26 = int_to_ptr.vmem [resolvable:$true] %s145_s26 }
  0x12   : > { %p1197_p2 = pnand %p848_p1, %p1158_p4  ;;  %s1088_s29 = smov [#allocation5]  }
  0x13   : > { %p831_p13 = pneg %p1179_p12  ;;  %s158_s30 = sshll.u32 %s1088_s29, 4  ;;  %s1201_s30 = int_to_ptr.vmem [resolvable:$true] %s158_s30 }
  0x14   : > { %s909_s6 = scalar_lea.hbm %s1383_s0, 256 }
  0x15   : > { %p1191_p5 = pnand %p831_p13, %p1387_p3  ;;  %p910_p7 = scmp.ne.s32.totalorder %s1383_s0, %s909_s6 }
  0x16   : > { %p916_p13 = scmp.lt.u32.totalorder %s909_s6, %s1383_s0 }
  0x17   : > { %p911_p9 = pneg %p1191_p5 }
  0x19   : > { %p912_p4 = pnand %p911_p9, %p910_p7 }
  0x1b   : > { %p913_p11 = pneg %p912_p4 }
  0x1d   : > { %p918_p1 = pnand %p916_p13, %p913_p11 }
  0x1f   : > { %921 = shalt.err (!%p918_p1)
}
  0x20   : > { %s922_s11 = scalar_lea.vmem %s1183_s26, 256  ;;  %p930_p8 = scmp.lt.s32.totalorder %s1183_s26, %s1183_s26 }
  0x21   : > { %p923_p0 = scmp.ne.s32.totalorder %s1183_s26, %s922_s11  ;;  %p931_p7 = scmp.lt.s32.totalorder %s922_s11, %s922_s11 }
  0x23   : > { %p925_p3 = pnand %p923_p0, %p911_p9  ;;  %p932_p4 = por %p931_p7, %p930_p8 }
  0x25   : > { %p926_p10 = pneg %p925_p3 }
  0x27   : > { %p933_p6 = pnand %p932_p4, %p926_p10 }
  0x29   : > { %936 = shalt.err (!%p933_p6)
}
  0x2a   : > { %s1089_s19 = smov 128   ;;  %s1090_s20 = smov 8  }
  0x2b   : > { %834 = dma.hbm_to_vmem [thread:$0]  (!%p1191_p5), %s1383_s0, 256, %s1183_s26, [#allocation3], %s1089_s19, %s1089_s19, %s1090_s20  }
  0x2c   : > { %s937_s6 = scalar_lea.hbm %s1384_s1, 2048 }
  0x2d   : > { %p938_p3 = scmp.ne.s32.totalorder %s1384_s1, %s937_s6  ;;  %p944_p10 = scmp.lt.u32.totalorder %s937_s6, %s1384_s1 }
  0x2f   : > { %p940_p6 = pnand %p938_p3, %p911_p9 }
  0x31   : > { %p941_p8 = pneg %p940_p6 }
  0x33   : > { %p946_p0 = pnand %p944_p10, %p941_p8 }
  0x35   : > { %949 = shalt.err (!%p946_p0)
}
  0x36   : > { %s950_s26 = scalar_lea.vmem %s1201_s30, 2048  ;;  %p958_p7 = scmp.lt.s32.totalorder %s1201_s30, %s1201_s30 }
  0x37   : > { %p951_p11 = scmp.ne.s32.totalorder %s1201_s30, %s950_s26  ;;  %p959_p4 = scmp.lt.s32.totalorder %s950_s26, %s950_s26 }
  0x39   : > { %p953_p13 = pnand %p951_p11, %p911_p9  ;;  %p960_p3 = por %p959_p4, %p958_p7 }
  0x3b   : > { %p954_p1 = pneg %p953_p13 }
  0x3d   : > { %p961_p6 = pnand %p960_p3, %p954_p1 }
  0x3f   : > { %964 = shalt.err (!%p961_p6)
}
  0x40   : > { %837 = dma.hbm_to_vmem [thread:$0]  (!%p1191_p5), %s1384_s1, 2048, %s1201_s30, [#allocation6], %s1089_s19, %s1089_s19, %s1090_s20  }
  0x41   : > { %s81_s29 = sadd.s32 1, %s1073_s14  ;;  %s30_s4 = sadd.s32 1, %s1081_s16 }
  0x42   : > { %s172_s5 = sand.u32 1, %s1085_s17   ;;  %p32_p9 = scmp.ge.s32.totalorder %s30_s4, 2 }
  0x43   : > { %s174_s6 = sand.u32 1, %s1073_s14   ;;  %s643_s27 = sshll.u32 %s1081_s16, 9 }
  0x44   : > { %s1411_s4 = smov (%p32_p9, %s30_s4), 0  ;;  %s628_s7 = sshll.u32 %s174_s6, 5 }
  0x45   : > { %s1265_s10 = scalar_lea.hbm %s1385_s2, %s643_s27  ;;  %s76_s30 = ssub.s32 %s1081_s16, %s1411_s4 }
  0x46   : > { %p79_p5 = scmp.eq.s32.totalorder %s76_s30, 0  ;;  %s176_s19 = scalar_lea.vmem [#allocation7], %s628_s7 }
  0x47   : > { %s185_s20 = sshll.u32 %s176_s19, 4  ;;  %s1274_s11 = scalar_lea.sflag [#allocation3], %s172_s5  ;;  %s1269_s20 = int_to_ptr.vmem [resolvable:$true] %s185_s20 }
  0x48   : > { %s1272_s26 = scalar_select %p79_p5, %s1073_s14, %s81_s29  }
  0x49   : > { %s965_s25 = scalar_lea.hbm %s1265_s10, 512  ;;  %p967_p10 = pneg %p1197_p2 }
  0x4a   : > { %p966_p8 = scmp.ne.s32.totalorder %s1265_s10, %s965_s25  ;;  %s970_s8 = scalar_lea.hbm %s1385_s2, 1024 }
  0x4b   : > { %p971_p13 = scmp.lt.u32.totalorder %s1265_s10, %s1385_s2  ;;  %p972_p1 = scmp.lt.u32.totalorder %s970_s8, %s965_s25 }
  0x4c   : > { %p968_p0 = pnand %p967_p10, %p966_p8  ;;  %p974_p4 = scmp.lt.u32.totalorder %s965_s25, %s1265_s10 }
  0x4d   : > { %p973_p7 = por %p972_p1, %p971_p13 }
  0x4e   : > { %p969_p11 = pneg %p968_p0 }
  0x4f   : > { %p975_p3 = por %p974_p4, %p973_p7 }
  0x51   : > { %p976_p6 = pnand %p975_p3, %p969_p11 }
  0x53   : > { %979 = shalt.err (!%p976_p6)
}
  0x54   : > { %s980_s29 = scalar_lea.vmem %s1269_s20, 512  ;;  %s1091_s5 = smov [#allocation7]  }
  0x55   : > { %p981_p9 = scmp.ne.s32.totalorder %s1269_s20, %s980_s29  ;;  %s985_s30 = sshll.u32 %s1091_s5, 4  ;;  %s986_s30 = int_to_ptr.vmem [resolvable:$false] %s985_s30 }
  0x56   : > { %s987_s19 = scalar_lea.vmem %s986_s30, 1024  ;;  %p988_p0 = scmp.lt.s32.totalorder %s1269_s20, %s986_s30 }
  0x57   : > { %p983_p5 = pnand %p981_p9, %p967_p10  ;;  %p989_p13 = scmp.lt.s32.totalorder %s987_s19, %s980_s29 }
  0x59   : > { %p984_p8 = pneg %p983_p5  ;;  %p990_p1 = por %p989_p13, %p988_p0 }
  0x5b   : > { %p991_p7 = pnand %p990_p1, %p984_p8 }
  0x5d   : > { %994 = shalt.err (!%p991_p7)
}
  0x5e   : > { %s1092_s25 = smov 256   ;;  %s1093_s6 = smov 16  }
  0x5f   : > { %841 = dma.hbm_to_vmem [thread:$0]  (!%p1197_p2), %s1265_s10, 512, %s1269_s20, %s1274_s11, %s1092_s25, %s1092_s25, %s1093_s6  }
  0x60   : > { %197 = sbr.rel (%p1179_p12) target bundleno = 566 (0x236), region = 32  ;;  %p1397_p10 = scmp.eq.s32.totalorder (!%p1179_p12), %s1149_s18, 0 }
  0x67   : > { %1048 = dma.done.wait (%p1397_p10), [#allocation3], 256   ;;  %p1398_p11 = pmov %p1397_p10 }
  0x68   : > { %p1399_p4 = pmov %p1397_p10 }
  0x69   : > { %1050 = vsyncadd (%p1398_p11), [#allocation3], 4294967040 }
  0x6a   : > { %1052 = dma.done.wait (%p1399_p4), [#allocation6], 2048   ;;  %p1400_p3 = pmov %p1399_p4 }
  0x6b   : > { %s207_s28 = sand.u32 1, %s1149_s18   ;;  %s209_s10 = sand.u32 1, %s1069_s13  }
  0x6c   : > { %1054 = vsyncadd (%p1400_p3), [#allocation6], 4294965248  ;;  %s1316_s24 = sshll.u32 %s209_s10, 5  ;;  %s208_s20 = scalar_lea.sflag [#allocation3], %s207_s28 }
  0x6d   : > { %s211_s11 = scalar_lea.vmem [#allocation7], %s1316_s24  ;;  %p1401_p12 = scmp.ne.s32.totalorder %s1391_s21, 0 }
  0x6f   : > { %1056 = dma.done.wait (%p1401_p12), %s208_s20, 512  }
  0x70   : > { %1058 = vsyncadd (%p1401_p12), %s208_s20, 4294966784  ;;  %v1094_v0 = vmov 0.0   ;;  %v255_v1 = vld [vmem:[%s211_s11 + $0x8] sm:$0xff]  ;;  %v257_v2 = vld [vmem:[%s211_s11 + $0x18] sm:$0xff]  ;;  %vm258_vm0 = vcmask 130048   ;;  %s233_s18 = scalar_lea.vmem [#allocation8], %s1316_s24 }
  0x71   : > { %329 = vmatprep.mubr.f32.mxu0 %v1094_v0  ;;  %v254_v3 = vld [vmem:[%s211_s11] sm:$0xff]  ;;  %v751_v4 = vpack.c.bf16 %v257_v2, %v255_v1  ;;  %v256_v5 = vld [vmem:[%s211_s11 + $0x10] sm:$0xff]  ;;  %v239_v8 = vld [vmem:[#allocation5 + $0x8] sm:$0xff]  ;;  %s516_s21 = sshll.u32 %s233_s18, 4  ;;  %s644_s27 = sshll.u32 %s1077_s15, 9  ;;  %s1327_s21 = int_to_ptr.vmem [resolvable:$true] %s516_s21 }
  0x72   : > { %v753_v6 = vpack.c.bf16 %v256_v5, %v254_v3  ;;  %v238_v7 = vld [vmem:[#allocation5] sm:$0xff]  ;;  %v240_v9 = vld [vmem:[#allocation5 + $0x10] sm:$0xff]  ;;  %v241_v11 = vld [vmem:[#allocation5 + $0x18] sm:$0xff]  ;;  %s1332_s9 = scalar_lea.hbm %s1386_s3, %s644_s27  ;;  %s1336_s15 = scalar_lea.sflag [#allocation4], %s209_s10 }
  0x73   : > { %752 = vmatprep.subr.bf16.mxu0 %v751_v4  ;;  %v755_v10 = vpack.c.bf16 %v239_v8, %v238_v7  ;;  %v236_v12 = vld [vmem:[#allocation2] sm:$0xff]  ;;  %v759_v13 = vpack.c.bf16 %v241_v11, %v240_v9  ;;  %v242_v14 = vld [vmem:[#allocation5 + $0x20] sm:$0xff]  ;;  %v243_v15 = vld [vmem:[#allocation5 + $0x28] sm:$0xff]  ;;  %s995_s29 = scalar_lea.vmem %s1327_s21, 512  ;;  %p1402_p6 = scmp.ne.s32.totalorder %s1392_s22, 0 }
  0x74   : > { %754 = vmatpush1.bf16.msra.mxu0 %v753_v6  ;;  %v763_v16 = vpack.c.bf16 %v243_v15, %v242_v14  ;;  %v237_v17 = vld [vmem:[#allocation2 + $0x8] sm:$0xff]  ;;  %v244_v18 = vld [vmem:[#allocation5 + $0x30] sm:$0xff]  ;;  %v246_v21 = vld [vmem:[#allocation5 + $0x40] sm:$0xff]  ;;  %p996_p2 = scmp.ne.s32.totalorder %s1327_s21, %s995_s29  ;;  %s1095_s5 = smov [#allocation8]  }
  0x75   : > { %756 = vmatprep.subr.bf16.mxu1 %v755_v10  ;;  %788 = vmatprep.subr.bf16.mxu0 %v755_v10  ;;  %v245_v19 = vld [vmem:[#allocation5 + $0x38] sm:$0xff]  ;;  %v247_v22 = vld [vmem:[#allocation5 + $0x48] sm:$0xff]  ;;  %v248_v24 = vld [vmem:[#allocation5 + $0x50] sm:$0xff]  ;;  %s999_s30 = sshll.u32 %s1095_s5, 4  ;;  %s1000_s30 = int_to_ptr.vmem [resolvable:$false] %s999_s30 }
  0x76   : > { %758 = vmatpush3.bf16.msra.mxu1 %v755_v10  ;;  %v767_v20 = vpack.c.bf16 %v245_v19, %v244_v18  ;;  %v771_v23 = vpack.c.bf16 %v247_v22, %v246_v21  ;;  %v249_v25 = vld [vmem:[#allocation5 + $0x58] sm:$0xff]  ;;  %v250_v27 = vld [vmem:[#allocation5 + $0x60] sm:$0xff]  ;;  %v251_v28 = vld [vmem:[#allocation5 + $0x68] sm:$0xff]  ;;  %p997_p9 = pnand %p996_p2, %p1402_p6  ;;  %s1001_s19 = scalar_lea.vmem %s1000_s30, 1024 }
  0x77   : > { %636 = vmatmul.mubr.msk.f32.vlgmr.msra.gmra.mrb[0].mxu0 %vm258_vm0, %v236_v12  ;;  %760 = vmatprep.subr.bf16.mxu1 %v759_v13  ;;  %v775_v26 = vpack.c.bf16 %v249_v25, %v248_v24  ;;  %v779_v29 = vpack.c.bf16 %v251_v28, %v250_v27  ;;  %v252_v30 = vld [vmem:[#allocation5 + $0x70] sm:$0xff]  ;;  %v253_v31 = vld [vmem:[#allocation5 + $0x78] sm:$0xff]  ;;  %p1002_p8 = scmp.lt.s32.totalorder %s1327_s21, %s1000_s30  ;;  %p1003_p0 = scmp.lt.s32.totalorder %s1001_s19, %s995_s29 }
  0x78   : > { %335 = vmatprep.mubr.f32.mxu0 %v1094_v0  ;;  %790 = vmatpush3.bf16.msra.mxu0 %v755_v10  ;;  %v783_v32 = vpack.c.bf16 %v253_v31, %v252_v30  ;;  %p998_p5 = pneg %p997_p9 }
  0x79   : > { %792 = vmatprep.subr.bf16.mxu0 %v759_v13  ;;  %p1004_p13 = por %p1003_p0, %p1002_p8 }
  0x7a   : > { %762 = vmatpush3.bf16.msra.mxu1 %v759_v13 }
  0x7b   : > { %637 = vmatmul.mubr.msk.f32.gmra.mrb[2].mxu0 %vm258_vm0, %v237_v17  ;;  %764 = vmatprep.subr.bf16.mxu1 %v763_v16  ;;  %p1005_p1 = pnand %p1004_p13, %p998_p5 }
  0x7c   : > { %794 = vmatpush3.bf16.msra.mxu0 %v759_v13 }
  0x7d   : > { %796 = vmatprep.subr.bf16.mxu0 %v763_v16 }
  0x7e   : > { %766 = vmatpush3.bf16.msra.mxu1 %v763_v16 }
  0x7f   : > { %768 = vmatprep.subr.bf16.mxu1 %v767_v20 }
  0x80   : > { %798 = vmatpush3.bf16.msra.mxu0 %v763_v16 }
  0x81   : > { %800 = vmatprep.subr.bf16.mxu0 %v767_v20 }
  0x82   : > { %770 = vmatpush3.bf16.msra.mxu1 %v767_v20 }
  0x83   : > { %772 = vmatprep.subr.bf16.mxu1 %v771_v23 }
  0x84   : > { %802 = vmatpush3.bf16.msra.mxu0 %v767_v20 }
  0x85   : > { %804 = vmatprep.subr.bf16.mxu0 %v771_v23 }
  0x86   : > { %774 = vmatpush3.bf16.msra.mxu1 %v771_v23 }
  0x87   : > { %776 = vmatprep.subr.bf16.mxu1 %v775_v26 }
  0x88   : > { %806 = vmatpush3.bf16.msra.mxu0 %v771_v23 }
  0x89   : > { %808 = vmatprep.subr.bf16.mxu0 %v775_v26 }
  0x8a   : > { %778 = vmatpush3.bf16.msra.mxu1 %v775_v26 }
  0x8b   : > { %780 = vmatprep.subr.bf16.mxu1 %v779_v29 }
  0x8c   : > { %810 = vmatpush3.bf16.msra.mxu0 %v775_v26 }
  0x8d   : > { %812 = vmatprep.subr.bf16.mxu0 %v779_v29 }
  0x8e   : > { %782 = vmatpush3.bf16.msra.mxu1 %v779_v29 }
  0x8f   : > { %784 = vmatprep.subr.bf16.mxu1 %v783_v32 }
  0x90   : > { %814 = vmatpush3.bf16.msra.mxu0 %v779_v29 }
  0x91   : > { %816 = vmatprep.subr.bf16.mxu0 %v783_v32 }
  0x92   : > { %786 = vmatpush3.bf16.msra.mxu1 %v783_v32 }
  0x94   : > { %818 = vmatpush3.bf16.msra.mxu0 %v783_v32 }
 0x14a   : > { %v331_v33 = vpop.f32.mrb[0].mxu0 }
 0x14b   : > { %v333_v34 = vpop.f32.mrb[1].mxu0  ;;  %713 = vmatprep.mubr.f32.mxu1 %v331_v33 }
 0x14c   : > { %748 = vmatprep.mubr.f32.mxu0 %v333_v34 }
 0x14e   : > { %v337_v35 = vpop.f32.mrb[2].mxu0 }
 0x14f   : > { %v339_v36 = vpop.f32.mrb[3].mxu0  ;;  %714 = vmatmul.mubr.f32.vlgmr.msra.gmra.mrb[0].mxu1 %v337_v35 }
 0x150   : > { %749 = vmatmul.mubr.f32.vlgmr.msra.gmra.mrb[4].mxu0 %v339_v36 }
 0x222   : > { %v715_v37 = vpop.f32.mrb[0].mxu1 }
 0x223   : > { %v418_v38 = vmax.f32 %v715_v37, 0.0  ;;  %v408_v39 = vpop.f32.mrb[1].mxu1  ;;  %v750_v40 = vpop.f32.mrb[4].mxu0 }
 0x224   : > { %v417_v41 = vmax.f32 %v408_v39, 0.0  ;;  %v497_v42 = vmax.f32 %v750_v40, 0.0  ;;  %v487_v43 = vpop.f32.mrb[5].mxu0 }
 0x225   : > { %420 = vst [vmem:[%s233_s18 + $0x10] sm:$0xff] %v418_v38  ;;  %v496_v44 = vmax.f32 %v487_v43, 0.0 }
 0x226   : > { %419 = vst [vmem:[%s233_s18] sm:$0xff] %v417_v41  ;;  %499 = vst [vmem:[%s233_s18 + $0x18] sm:$0xff] %v497_v42 }
 0x227   : > { %498 = vst [vmem:[%s233_s18 + $0x8] sm:$0xff] %v496_v44 }
 0x228   : > { %1008 = shalt.err (!%p1005_p1)
}
 0x229   : > { %s1009_s25 = scalar_lea.hbm %s1332_s9, 512  ;;  %s1013_s10 = scalar_lea.hbm %s1386_s3, 1024 }
 0x22a   : > { %p1010_p7 = scmp.ne.s32.totalorder %s1332_s9, %s1009_s25  ;;  %p1014_p4 = scmp.lt.u32.totalorder %s1332_s9, %s1386_s3 }
 0x22b   : > { %p1015_p3 = scmp.lt.u32.totalorder %s1013_s10, %s1009_s25  ;;  %p1017_p2 = scmp.lt.u32.totalorder %s1009_s25, %s1332_s9 }
 0x22c   : > { %p1011_p10 = pnand %p1010_p7, %p1402_p6 }
 0x22d   : > { %p1016_p12 = por %p1015_p3, %p1014_p4 }
 0x22e   : > { %p1012_p11 = pneg %p1011_p10 }
 0x22f   : > { %p1018_p9 = por %p1017_p2, %p1016_p12 }
 0x231   : > { %p1019_p5 = pnand %p1018_p9, %p1012_p11 }
 0x233   : > { %1022 = shalt.err (!%p1019_p5)
}
 0x234   : > { %s1096_s11 = smov 256   ;;  %s1097_s18 = smov 16  }
 0x235   : > { %829 = dma.vmem_to_hbm [thread:$0]  (%p1402_p6), %s1327_s21, 512, %s1332_s9, %s1336_s15, %s1096_s11, %s1096_s11, %s1097_s18  }
 0x236 PF: > { %s531_s27 = sand.u32 1, %s1065_s12   ;;  %p1403_p8 = scmp.ne.s32.totalorder %s1393_s23, 0 }
 0x237   : > { %p1404_p0 = scmp.ge.s32.totalorder %s1085_s17, 2  ;;  %s532_s8 = scalar_lea.sflag [#allocation4], %s531_s27 }
 0x239   : > { %p843_p13 = pnand %p1404_p0, %p1403_p8 }
 0x23b   : > { %1060 = dma.done.wait (!%p843_p13), %s532_s8, 512  }
 0x23c   : > { %1062 = vsyncadd (!%p843_p13), %s532_s8, 4294966784  ;;  %s18_s17 = sadd.s32 1, %s1085_s17   ;;  %s1405_s12 = smov %s1069_s13 }
 0x23d   : > { %p15_p1 = scmp.ge.s32.totalorder %s18_s17, 4   ;;  %s1406_s13 = smov %s1073_s14 }
 0x23e   : > { %s1407_s14 = smov %s1272_s26  ;;  %s1408_s15 = smov %s1081_s16 }
 0x23f   : > { %s1409_s16 = smov %s1411_s4  ;;  %17 = sbr.rel (!%p15_p1) target bundleno = 6 (0x6), region = 84 }
 0x246   :  { %537 = vsyncpa [#allocation3], 1 }
 0x247   :  { %539 = vsyncpa [#allocation3 + $0x1], 1 }
 0x248   :  { %540 = vsyncpa [#allocation6], 1 }
 0x249   :  { %541 = vsyncpa [#allocation4], 1 }
 0x24a   :  { %543 = vsyncpa [#allocation4 + $0x1], 1 }

</bundles_post_ra>
